<compile_context>
chip_gen: v5e
topology: v5e:2x2
jax: 0.10.0
libtpu: 0.0.40
codegen_flags: <defaults>
</compile_context>

<pallas_src>
import jax
import jax.numpy as jnp
from jax.experimental import pallas as pl
from jax.experimental.pallas import tpu as pltpu

EPS = 1e-6


def _sublayer_output_kernel(x_ref, a2_ref, b2_ref, w_ref, bias_ref, o_ref):
    # x_ref/o_ref: (TM, D); a2/b2/bias: (1, D) f32; w_ref: (D_in, D_out).
    x = x_ref[...].astype(jnp.float32)
    d = x.shape[-1]

    # --- LayerNorm, PyTorch semantics: unbiased std, eps added to the std.
    #     Two-pass (mean, then centered sum of squares) for numerical safety.
    mean = jnp.sum(x, axis=-1, keepdims=True) * (1.0 / d)
    diff = x - mean
    var = jnp.sum(diff * diff, axis=-1, keepdims=True) * (1.0 / (d - 1))
    std = jnp.sqrt(var)
    inv = pl.reciprocal(std + EPS, approx=True)  # EUP slot; free in a mem-bound kernel
    normed = diff * inv * a2_ref[...] + b2_ref[...]

    # --- sublayer: Linear(D, D). f32 operands when D <= 128 (w_ref is f32),
    #     bf16 operands / f32 accumulation for larger D.
    y = jnp.dot(normed.astype(w_ref.dtype), w_ref[...],
                preferred_element_type=jnp.float32)
    y = y + bias_ref[...]

    # --- dropout (eval mode -> identity) + residual add.
    o_ref[...] = (x + y).astype(o_ref.dtype)


def _round_up(n, m):
    return ((n + m - 1) // m) * m


def prepare_params(a2, b2, w, bias):
    """One-time (init-time) parameter prep.

    The torch-style (D_out, D_in) weight is transposed to (D_in, D_out) and
    cast to bf16 only when D > 128, so no per-call transpose/cast op remains.
    """
    d = w.shape[0]
    w_dtype = jnp.float32 if d <= 128 else jnp.bfloat16
    return (a2.reshape(1, d).astype(jnp.float32),
            b2.reshape(1, d).astype(jnp.float32),
            w.T.astype(w_dtype),
            bias.reshape(1, d).astype(jnp.float32))


def _physical_vmem_bytes():
    try:
        return int(pltpu.get_tpu_info().vmem_capacity_bytes)
    except Exception:
        return 64 * 1024 * 1024  # conservative fallback (v7x per-TensorCore)


def _pick_row_tile(n_rows, d, itemsize, target_tile_bytes=2 * 1024 * 1024):
    """Row tile: multiple of 8 sublanes, ~1-4 MiB of activations per tile, and
    at least two tiles when possible so both v7x TensorCores get work."""
    if n_rows < 8:
        return n_rows                              # block == full (short) row extent
    tm_target = _round_up(max(512, min(8192, target_tile_bytes // (d * itemsize))), 8)
    tm_cap = max(8, _round_up(-(-n_rows // 2), 8))  # ceil(N/2), rounded up to 8
    return max(8, min(tm_target, tm_cap))


def sublayer_output(x, params):
    """x: (B, S, D) activations; params from prepare_params()."""
    a2_2d, b2_2d, w_t, bias_2d = params
    B, S, D = x.shape
    assert D > 1, "unbiased std needs D > 1"
    assert w_t.shape == (D, D)

    N = B * S
    x2d = x.reshape(N, D)          # no padding: a ragged edge block is harmless
    itemsize = jnp.dtype(x.dtype).itemsize

    TM = _pick_row_tile(N, D, itemsize)
    grid = (pl.cdiv(N, TM),)

    # VMEM request from actual buffer counts: activation tiles are
    # double-buffered by the pipeline; grid-invariant operands are also
    # allocated x2 by the default pipeliner (negligible until D is very large).
    w_bytes = D * D * jnp.dtype(w_t.dtype).itemsize
    act_tile_bytes = TM * D * itemsize
    needed = (2 * w_bytes                 # resident weight (x2: default buffering)
              + 2 * act_tile_bytes        # input tile, double-buffered
              + 2 * act_tile_bytes        # output tile, double-buffered
              + 2 * 3 * D * 4)            # a2 / b2 / bias
    vmem_cap = (_physical_vmem_bytes() * 4) // 5   # ~80%: headroom for Mosaic scratch
    vmem_limit = int(max(16 * 1024 * 1024, min(vmem_cap, needed + (4 << 20))))

    out = pl.pallas_call(
        _sublayer_output_kernel,
        out_shape=jax.ShapeDtypeStruct((N, D), x.dtype),
        grid_spec=pltpu.PrefetchScalarGridSpec(
            num_scalar_prefetch=0,
            grid=grid,
            in_specs=[
                pl.BlockSpec((TM, D), lambda i: (i, 0)),   # x row tile (pipelined)
                pl.BlockSpec((1, D), lambda i: (0, 0)),    # a2   (grid-invariant)
                pl.BlockSpec((1, D), lambda i: (0, 0)),    # b2   (grid-invariant)
                pl.BlockSpec((D, D), lambda i: (0, 0)),    # weight (grid-invariant)
                pl.BlockSpec((1, D), lambda i: (0, 0)),    # bias (grid-invariant)
            ],
            out_specs=pl.BlockSpec((TM, D), lambda i: (i, 0)),
        ),
        compiler_params=pltpu.CompilerParams(
            dimension_semantics=("parallel",),  # independent row tiles; feeds both v7x TCs
            vmem_limit_bytes=vmem_limit,
        ),
    )(x2d, a2_2d, b2_2d, w_t, bias_2d)

    return out.reshape(B, S, D)


def _reference(x, a2, b2, w, bias):
    # Pure-JAX reference mirroring the PyTorch forward (f32 everywhere).
    mean = jnp.mean(x, axis=-1, keepdims=True)
    diff = x - mean
    std = jnp.sqrt(jnp.sum(diff * diff, axis=-1, keepdims=True) / (x.shape[-1] - 1))
    normed = a2 * diff / (std + EPS) + b2
    y = normed @ w.T + bias
    return x + y


if __name__ == "__main__":
    key = jax.random.PRNGKey(0)
    B, S, D = 2, 8, 32  # batch, seq, hidden (size = D)

    k_x, k_w, k_b, k_a2, k_b2 = jax.random.split(key, 5)
    x = jax.random.normal(k_x, (B, S, D), dtype=jnp.float32)

    # LayerNorm params (module init is ones/zeros; perturb slightly so the
    # scale/shift path is actually exercised).
    a2 = 1.0 + 0.1 * jax.random.normal(k_a2, (D,), dtype=jnp.float32)
    b2 = 0.05 * jax.random.normal(k_b2, (D,), dtype=jnp.float32)

    # Deterministic sublayer (Linear(D, D)) parameters, torch layout (D_out, D_in).
    w = jax.random.normal(k_w, (D, D), dtype=jnp.float32) * 0.05
    bias = jax.random.normal(k_b, (D,), dtype=jnp.float32) * 0.01

    params = prepare_params(a2, b2, w, bias)   # one-time, init-style prep
    out = sublayer_output(x, params)
    jax.block_until_ready(out)

    ref = _reference(x, a2, b2, w, bias)
    assert out.shape == (B, S, D)
    assert jnp.allclose(out, ref, atol=1e-2, rtol=1e-2), "mismatch vs reference"

    print("KERNEL_OK")
</pallas_src>

<mosaic_0001>
module attributes {stable_mosaic.version = 11 : i64} {
  func.func @_sublayer_output_kernel(%arg0: i32, %arg1: memref<8x32xf32, #tpu.memory_space<vmem>>, %arg2: memref<1x32xf32, #tpu.memory_space<vmem>>, %arg3: memref<1x32xf32, #tpu.memory_space<vmem>>, %arg4: memref<32x32xf32, #tpu.memory_space<vmem>>, %arg5: memref<1x32xf32, #tpu.memory_space<vmem>>, %arg6: memref<8x32xf32, #tpu.memory_space<vmem>>) attributes {dimension_semantics = [#tpu.dimension_semantics<parallel>], iteration_bounds = array<i64: 2>, scalar_prefetch = 0 : i64, scratch_operands = 0 : i64, tpu.core_type = #tpu.core_type<tc>, window_params = [{transform_indices = @transform_0, window_bounds = array<i64: 8, 32>}, {pipeline_mode = #tpu.pipeline_mode<synchronous>, transform_indices = @transform_1, window_bounds = array<i64: 1, 32>}, {pipeline_mode = #tpu.pipeline_mode<synchronous>, transform_indices = @transform_2, window_bounds = array<i64: 1, 32>}, {pipeline_mode = #tpu.pipeline_mode<synchronous>, transform_indices = @transform_3, window_bounds = array<i64: 32, 32>}, {pipeline_mode = #tpu.pipeline_mode<synchronous>, transform_indices = @transform_4, window_bounds = array<i64: 1, 32>}, {transform_indices = @transform_5, window_bounds = array<i64: 8, 32>}]} {
    %c0 = arith.constant 0 : index
    %c0_0 = arith.constant 0 : index
    %0 = vector.load %arg1[%c0, %c0_0] : memref<8x32xf32, #tpu.memory_space<vmem>>, vector<8x32xf32>
    %cst = arith.constant dense<0.000000e+00> : vector<8xf32>
    %1 = vector.multi_reduction <add>, %0, %cst [1] : vector<8x32xf32> to vector<8xf32>
    %2 = vector.shape_cast %1 : vector<8xf32> to vector<8x1xf32>
    %cst_1 = arith.constant 3.125000e-02 : f32
    %3 = vector.broadcast %cst_1 : f32 to vector<8x1xf32>
    %4 = arith.mulf %2, %3 : vector<8x1xf32>
    %5 = vector.broadcast %4 : vector<8x1xf32> to vector<8x32xf32>
    %6 = arith.subf %0, %5 : vector<8x32xf32>
    %7 = arith.mulf %6, %6 : vector<8x32xf32>
    %cst_2 = arith.constant dense<0.000000e+00> : vector<8xf32>
    %8 = vector.multi_reduction <add>, %7, %cst_2 [1] : vector<8x32xf32> to vector<8xf32>
    %9 = vector.shape_cast %8 : vector<8xf32> to vector<8x1xf32>
    %cst_3 = arith.constant 0.0322580636 : f32
    %10 = vector.broadcast %cst_3 : f32 to vector<8x1xf32>
    %11 = arith.mulf %9, %10 : vector<8x1xf32>
    %12 = math.sqrt %11 : vector<8x1xf32>
    %cst_4 = arith.constant 9.99999997E-7 : f32
    %13 = vector.broadcast %cst_4 : f32 to vector<8x1xf32>
    %14 = arith.addf %12, %13 : vector<8x1xf32>
    %15 = tpu.reciprocal %14 {approx = true} : vector<8x1xf32> -> vector<8x1xf32>
    %16 = vector.broadcast %15 : vector<8x1xf32> to vector<8x32xf32>
    %17 = arith.mulf %6, %16 : vector<8x32xf32>
    %c0_5 = arith.constant 0 : index
    %c0_6 = arith.constant 0 : index
    %18 = vector.load %arg2[%c0_5, %c0_6] : memref<1x32xf32, #tpu.memory_space<vmem>>, vector<1x32xf32>
    %19 = vector.broadcast %18 : vector<1x32xf32> to vector<8x32xf32>
    %20 = arith.mulf %17, %19 : vector<8x32xf32>
    %c0_7 = arith.constant 0 : index
    %c0_8 = arith.constant 0 : index
    %21 = vector.load %arg3[%c0_7, %c0_8] : memref<1x32xf32, #tpu.memory_space<vmem>>, vector<1x32xf32>
    %22 = vector.broadcast %21 : vector<1x32xf32> to vector<8x32xf32>
    %23 = arith.addf %20, %22 : vector<8x32xf32>
    %c0_9 = arith.constant 0 : index
    %c0_10 = arith.constant 0 : index
    %24 = vector.load %arg4[%c0_9, %c0_10] : memref<32x32xf32, #tpu.memory_space<vmem>>, vector<32x32xf32>
    %cst_11 = arith.constant dense<0.000000e+00> : vector<8x32xf32>
    %25 = tpu.matmul %23, %24, %cst_11 {dimension_numbers = #tpu.dot_dimension_numbers<[1], [0], [0], [1], [0, 0, 1, 1], [], []>} : vector<8x32xf32>, vector<32x32xf32>, vector<8x32xf32> -> vector<8x32xf32>
    %c0_12 = arith.constant 0 : index
    %c0_13 = arith.constant 0 : index
    %26 = vector.load %arg5[%c0_12, %c0_13] : memref<1x32xf32, #tpu.memory_space<vmem>>, vector<1x32xf32>
    %27 = vector.broadcast %26 : vector<1x32xf32> to vector<8x32xf32>
    %28 = arith.addf %25, %27 : vector<8x32xf32>
    %29 = arith.addf %0, %28 : vector<8x32xf32>
    %c0_14 = arith.constant 0 : index
    %c0_15 = arith.constant 0 : index
    %30 = vector.load %arg6[%c0_14, %c0_15] : memref<8x32xf32, #tpu.memory_space<vmem>>, vector<8x32xf32>
    tpu.vector_store %arg6[%c0_14, %c0_15], %29 {strides = array<i32>} : memref<8x32xf32, #tpu.memory_space<vmem>>, vector<8x32xf32>,
    return
  }
  func.func @transform_0(%arg0: i32) -> (i32, i32) {
    %c0_i32 = arith.constant 0 : i32
    %c0_i32_0 = arith.constant 0 : i32
    return %arg0, %c0_i32 : i32, i32
  }
  func.func @transform_1(%arg0: i32) -> (i32, i32) {
    %c0_i32 = arith.constant 0 : i32
    %c0_i32_0 = arith.constant 0 : i32
    %c0_i32_1 = arith.constant 0 : i32
    return %c0_i32, %c0_i32_0 : i32, i32
  }
  func.func @transform_2(%arg0: i32) -> (i32, i32) {
    %c0_i32 = arith.constant 0 : i32
    %c0_i32_0 = arith.constant 0 : i32
    %c0_i32_1 = arith.constant 0 : i32
    return %c0_i32, %c0_i32_0 : i32, i32
  }
  func.func @transform_3(%arg0: i32) -> (i32, i32) {
    %c0_i32 = arith.constant 0 : i32
    %c0_i32_0 = arith.constant 0 : i32
    %c0_i32_1 = arith.constant 0 : i32
    return %c0_i32, %c0_i32_0 : i32, i32
  }
  func.func @transform_4(%arg0: i32) -> (i32, i32) {
    %c0_i32 = arith.constant 0 : i32
    %c0_i32_0 = arith.constant 0 : i32
    %c0_i32_1 = arith.constant 0 : i32
    return %c0_i32, %c0_i32_0 : i32, i32
  }
  func.func @transform_5(%arg0: i32) -> (i32, i32) {
    %c0_i32 = arith.constant 0 : i32
    %c0_i32_0 = arith.constant 0 : i32
    return %arg0, %c0_i32 : i32, i32
  }
}

</mosaic_0001>

<bundles_post_ra>
// kernel: tpu_custom_call.1
= control target key start
LH: loop header
LB: loop body
LE: loop exit
PB: predicated region body
PF: predicated region fallthrough
CT: control target
= control target key end

     0   :  { %10 = vsyncpa [#allocation3], 0  ;;  %s892_s0 = inlined_call_operand.hbm [shape: f32[16,32], index: 0, kind: input, shape index: {}]   ;;  %s893_s1 = inlined_call_operand.hbm [shape: f32[1,32], index: 1, kind: input, shape index: {}]   ;;  %s894_s2 = inlined_call_operand.vmem [shape: f32[1,32], index: 2, kind: input, shape index: {}]   ;;  %s895_s3 = inlined_call_operand.hbm [shape: f32[32,32], index: 3, kind: input, shape index: {}]   ;;  %s896_s4 = inlined_call_operand.vmem [shape: f32[1,32], index: 4, kind: input, shape index: {}]   ;;  %s897_s5 = inlined_call_operand.hbm [shape: f32[16,32], index: 5, kind: output, shape index: {}]  }
   0x1   :  { %12 = vsyncpa [#allocation3 + $0x1], 0 }
   0x2   :  { %13 = vsyncpa [#allocation6], 0 }
   0x3   :  { %14 = vsyncpa [#allocation4], 0 }
   0x4   :  { %16 = vsyncpa [#allocation4 + $0x1], 0  ;;  %s737_s18 = smov 0   ;;  %s739_s19 = smov 0  }
   0x5   :  { %s741_s20 = smov 0   ;;  %s743_s21 = smov 0  }
   0x6 LB: > { %s758_s22 = sadd.s32 4294967295, %s701_s21   ;;  %s448_s23 = sadd.s32 4294967294, %s701_s21   ;;  %s701_s21 = sphi %s743_s21, %s907_s21   ;;  %s697_s20 = sphi %s741_s20, %s906_s20   ;;  %s693_s19 = sphi %s739_s19, %s905_s19   ;;  %s689_s18 = sphi %s737_s18, %s904_s18  }
   0x7   : > { %p42_p0 = scmp.ne.s32.totalorder %s693_s19, %s689_s18  ;;  %p43_p1 = scmp.eq.s32.totalorder %s758_s22, 0 }
   0x8   : > { %p150_p2 = scmp.eq.s32.totalorder %s758_s22, 1  ;;  %p156_p3 = scmp.eq.s32.totalorder %s448_s23, 1 }
   0x9   : > { %p767_p4 = por %p43_p1, %p42_p0  ;;  %p449_p5 = scmp.ge.s32.totalorder %s701_s21, 1 }
   0xa   : > { %p772_p6 = por %p156_p3, %p42_p0  ;;  %p163_p7 = scmp.lt.s32.totalorder %s701_s21, 3 }
   0xb   : > { %s175_s28 = sshll.u32 %s893_s1, 4  ;;  %s703_s30 = smov [#allocation5]   ;;  %s176_s28 = int_to_ptr.hbm [resolvable:$true] %s175_s28 }
   0xc   : > { %p780_p8 = pnand %p449_p5, %p163_p7  ;;  %s177_s6 = sshll.u32 %s703_s30, 4  ;;  %s178_s6 = int_to_ptr.vmem [resolvable:$true] %s177_s6 }
   0xd   : > { %s189_s9 = sshll.u32 %s895_s3, 4  ;;  %s704_s10 = smov [#allocation7]   ;;  %s190_s9 = int_to_ptr.hbm [resolvable:$true] %s189_s9 }
   0xe   : > { %p477_p10 = pneg %p780_p8  ;;  %s191_s11 = sshll.u32 %s704_s10, 4  ;;  %s192_s11 = int_to_ptr.vmem [resolvable:$true] %s191_s11 }
   0xf   : > { %s705_s12 = smov 128   ;;  %s706_s13 = smov 8  }
  0x10   : > { %p478_p11 = pnand %p477_p10, %p43_p1  ;;  %s793_s14 = sadd.s32 1, %s701_s21  }
  0x11   : > { %s26_s15 = ssub.s32 %s701_s21, %s793_s14  ;;  %s29_s16 = sadd.s32 1, %s697_s20 }
  0x12   : > { %480 = dma.hbm_to_vmem [thread:$0]  (!%p478_p11), %s176_s28, 16, %s178_s6, [#allocation6]  }
  0x13   : > { %483 = dma.hbm_to_vmem [thread:$0]  (!%p478_p11), %s190_s9, 512, %s192_s11, [#allocation6], %s705_s12, %s705_s12, %s706_s13  }
  0x14   : > { %p27_p12 = scmp.eq.s32.totalorder %s26_s15, 0  ;;  %p36_p13 = scmp.ne.s32.totalorder %s697_s20, %s693_s19 }
  0x15   : > { %p37_p0 = scmp.eq.s32.totalorder %s701_s21, 0  ;;  %p494_p7 = scmp.lt.s32.totalorder %s701_s21, 2 }
  0x16   : > { %s802_s17 = scalar_select %p27_p12, %s697_s20, %s29_s16  }
  0x17   : > { %p38_p3 = por %p37_p0, %p36_p13  ;;  %p806_p5 = por %p150_p2, %p36_p13 }
  0x18   : > { %s208_s26 = sand.u32 1, %s697_s20   ;;  %s454_s28 = sshll.u32 %s701_s21, 3 }
  0x19   : > { %s453_s27 = sshll.u32 %s208_s26, 3  ;;  %s216_s7 = scalar_lea.hbm %s892_s0, %s454_s28 }
  0x1a   : > { %s212_s8 = scalar_lea.vmem [#allocation2], %s453_s27  ;;  %s218_s10 = sshll.u32 %s216_s7, 4  ;;  %s219_s10 = int_to_ptr.hbm [resolvable:$true] %s218_s10 }
  0x1b   : > { %s220_s9 = sshll.u32 %s212_s8, 4  ;;  %p816_p10 = pnand %p494_p7, %p38_p3  ;;  %s221_s9 = int_to_ptr.vmem [resolvable:$true] %s220_s9 }
  0x1c   : > { %s209_s12 = scalar_lea.sflag [#allocation3], %s208_s26  ;;  %s601_s13 = sshra.s32 %s219_s10, 4  ;;  %s602_s13 = int_to_ptr.hbm [resolvable:$true] %s601_s13 }
  0x1d   : > { %s603_s15 = scalar_lea.hbm %s602_s13, 8  ;;  %p605_p11 = pneg %p816_p10 }
  0x1e   : > { %p604_p2 = scmp.ne.s32.totalorder %s602_s13, %s603_s15  ;;  %s608_s28 = scalar_lea.hbm %s892_s0, 16 }
  0x1f   : > { %p609_p0 = scmp.lt.s32.totalorder %s602_s13, %s892_s0  ;;  %p610_p3 = scmp.lt.s32.totalorder %s608_s28, %s603_s15 }
  0x20   : > { %p606_p12 = pnand %p605_p11, %p604_p2 }
  0x21   : > { %p611_p7 = por %p610_p3, %p609_p0 }
  0x22   : > { %p607_p13 = pneg %p606_p12 }
  0x24   : > { %p612_p9 = pnand %p611_p7, %p607_p13 }
  0x26   : > { %615 = shalt.err (!%p612_p9)
}
  0x27   : > { %487 = dma.hbm_to_vmem [thread:$0]  (!%p816_p10), %s219_s10, 128, %s221_s9, %s209_s12  }
  0x28   : > { %229 = sbr.rel (%p780_p8) target bundleno = 460 (0x1cc), region = 40  ;;  %s833_s26 = sand.u32 (!%p780_p8), 1, %s693_s19  }
  0x29   : > { %s456_s7 = sshll.u32 (!%p780_p8), %s833_s26, 3  ;;  %s232_s8 = scalar_lea.sflag (!%p780_p8), [#allocation3], %s833_s26 }
  0x2a   : > { %s235_s13 = scalar_lea.vmem (!%p780_p8), [#allocation2], %s456_s7 }
  0x2d   : > { %676 = dma.done.wait (%p767_p4), %s232_s8, 128  }
  0x2e   : > { %678 = vsyncadd (%p767_p4), %s232_s8, 4294967168 }
  0x2f   : > { %680 = dma.done.wait (%p43_p1), [#allocation6], 528  }
  0x30   : > { %682 = vsyncadd (%p43_p1), [#allocation6], 4294966768  ;;  %vm274_vm0 = vcmask 261120   ;;  %v273_v0 = vld [vmem:[%s235_s13] sm:$0xff]  ;;  %v310_v10 = vld [vmem:[#allocation7] sm:$0xff]  ;;  %s462_s9 = sshll.u32 %s758_s22, 3 }
  0x31   : > { %v275_v1 = vsel %vm274_vm0, %v273_v0, 0.0  ;;  %v313_v7 = vld [vmem:[#allocation7 + $0x18] sm:$0xff]  ;;  %v312_v8 = vld [vmem:[#allocation7 + $0x10] sm:$0xff]  ;;  %v311_v9 = vld [vmem:[#allocation7 + $0x8] sm:$0xff]  ;;  %s354_s16 = scalar_lea.hbm %s897_s5, %s462_s9  ;;  %s272_s27 = scalar_lea.vmem [#allocation8], %s456_s7 }
  0x32   : > { %276 = vadd.xlane.f32.xlu0 %v275_v1  ;;  %333 = vmatpush.msra.mxu0 %v313_v7  ;;  %v534_v24 = vld [vmem:[#allocation5] ss:$0 sm:$0xff]  ;;  %v535_v27 = vld [vmem:[%s894_s2] ss:$0 sm:$0xff]  ;;  %s356_s28 = sshll.u32 %s272_s27, 4  ;;  %s358_s30 = sshll.u32 %s354_s16, 4  ;;  %s357_s28 = int_to_ptr.vmem [resolvable:$true] %s356_s28  ;;  %s359_s30 = int_to_ptr.hbm [resolvable:$true] %s358_s30 }
  0x33   : > { %v536_v30 = vld [vmem:[%s896_s4] ss:$0 sm:$0xff]  ;;  %s344_s22 = scalar_lea.sflag [#allocation4], %s833_s26  ;;  %s645_s6 = sshra.s32 %s359_s30, 4  ;;  %s646_s6 = int_to_ptr.hbm [resolvable:$true] %s645_s6 }
  0x34   : > { %334 = vmatpush.msra.mxu0 %v312_v8  ;;  %s647_s8 = scalar_lea.hbm %s646_s6, 8  ;;  %s651_s7 = scalar_lea.hbm %s897_s5, 16 }
  0x35   : > { %p648_p1 = scmp.ne.s32.totalorder %s646_s6, %s647_s8  ;;  %p652_p9 = scmp.lt.s32.totalorder %s646_s6, %s897_s5 }
  0x36   : > { %335 = vmatpush.msra.mxu0 %v311_v9  ;;  %p653_p10 = scmp.lt.s32.totalorder %s651_s7, %s647_s8 }
  0x37   : > { %p649_p4 = pnand %p648_p1, %p806_p5 }
  0x38   : > { %336 = vmatpush.msra.mxu0 %v310_v10  ;;  %p654_p2 = por %p653_p10, %p652_p9 }
  0x39   : > { %p650_p8 = pneg %p649_p4 }
  0x3b   : > { %p655_p11 = pnand %p654_p2, %p650_p8 }
  0xa5   : > { %v277_v2 = vpop.xlane.xlu0 %276 }
  0xa6   : > { %v278_v3 = vmul.f32 0.03125, %v277_v2 }
  0xa8   : > { %v279_v4 = vsub.f32 %v273_v0, %v278_v3 }
  0xaa   : > { %v280_v5 = vmul.f32 %v279_v4, %v279_v4 }
  0xac   : > { %v281_v6 = vsel %vm274_vm0, %v280_v5, 0.0 }
  0xad   : > { %282 = vadd.xlane.f32.xlu0 %v281_v6 }
 0x120   : > { %v283_v11 = vpop.xlane.xlu0 %282 }
 0x121   : > { %v284_v12 = vmul.f32 0.032258064, %v283_v11 }
 0x123   : > { %537 = vrsqrt.f32 %v284_v12  ;;  %vm292_vm1 = vcmp.eq.f32.partialorder %v284_v12, inf  ;;  %v295_v20 = vand.u32 2147483648, %v284_v12  ;;  %vm294_vm2 = vcmp.eq.f32.partialorder %v284_v12, 0.0 }
 0x129   : > { %v538_v13 = vpop.eup %537 }
 0x12a   : > { %v286_v14 = vmul.f32 %v538_v13, %v284_v12 }
 0x12c   : > { %v287_v15 = vmul.f32 %v538_v13, %v286_v14 }
 0x12e   : > { %v288_v16 = vmul.f32 0.5, %v287_v15 }
 0x130   : > { %v289_v17 = vsub.f32 1.5, %v288_v16 }
 0x132   : > { %v290_v18 = vmul.f32 %v538_v13, %v289_v17 }
 0x134   : > { %v291_v19 = vmul.f32 %v290_v18, %v284_v12 }
 0x136   : > { %v293_v21 = vsel %vm292_vm1, %v284_v12, %v291_v19 }
 0x137   : > { %v296_v22 = vsel %vm294_vm2, %v295_v20, %v293_v21 }
 0x138   : > { %v297_v23 = vadd.f32 1e-06, %v296_v22 }
 0x13a   : > { %539 = vrcp.f32 %v297_v23 }
 0x140   : > { %v540_v25 = vpop.eup %539 }
 0x141   : > { %v299_v26 = vmul.f32 %v540_v25, %v279_v4 }
 0x143   : > { %v304_v28 = vmul.f32 %v534_v24, %v299_v26 }
 0x145   : > { %v309_v29 = vadd.f32 %v535_v27, %v304_v28 }
 0x147   : > { %460 = vmatmul.msk.f32.vlgmr.msra.gmra.mxu0 %vm274_vm0, %v309_v29 }
 0x1c4   : > { %v338_v31 = vpop.f32.mrf.mxu0 }
 0x1c5   : > { %v339_v32 = vadd.f32 %v536_v30, %v338_v31 }
 0x1c7   : > { %v341_v33 = vadd.f32 %v339_v32, %v273_v0 }
 0x1c9   : > { %342 = vst.msk [vmem:[%s272_s27] sm:$0xff] %vm274_vm0, %v341_v33 }
 0x1ca   : > { %658 = shalt.err (!%p655_p11)
}
 0x1cb   : > { %475 = dma.vmem_to_hbm [thread:$0]  (%p806_p5), %s357_s28, 128, %s359_s30, %s344_s22  }
 0x1cc PF: > { %s370_s26 = sand.u32 1, %s689_s18   ;;  %p903_p12 = scmp.ge.s32.totalorder %s701_s21, 2 }
 0x1cd   : > { %s371_s10 = scalar_lea.sflag [#allocation4], %s370_s26 }
 0x1ce   : > { %p489_p13 = pnand %p903_p12, %p772_p6 }
 0x1d0   : > { %p490_p0 = pneg %p489_p13 }
 0x1d2   : > { %684 = dma.done.wait (%p490_p0), %s371_s10, 128  }
 0x1d3   : > { %686 = vsyncadd (%p490_p0), %s371_s10, 4294967168  ;;  %p19_p3 = scmp.ge.s32.totalorder %s793_s14, 4   ;;  %s904_s18 = smov %s693_s19 }
 0x1d4   : > { %s905_s19 = smov %s697_s20  ;;  %s906_s20 = smov %s802_s17 }
 0x1d5   : > { %s907_s21 = smov %s793_s14  ;;  %21 = sbr.rel (!%p19_p3) target bundleno = 6 (0x6), region = 93 }
 0x1da   :  { %377 = vsyncpa [#allocation3], 1 }
 0x1db   :  { %379 = vsyncpa [#allocation3 + $0x1], 1 }
 0x1dc   :  { %380 = vsyncpa [#allocation6], 1 }
 0x1dd   :  { %381 = vsyncpa [#allocation4], 1 }
 0x1de   :  { %383 = vsyncpa [#allocation4 + $0x1], 1 }

</bundles_post_ra>
